<compile_context>
chip_gen: v5e
topology: v5e:2x2
jax: 0.10.0
libtpu: 0.0.40
codegen_flags: <defaults>
</compile_context>

<pallas_src>
import functools

import jax
import jax.numpy as jnp
from jax.experimental import pallas as pl
from jax.experimental.pallas import tpu as pltpu


def _transition_kernel(s_ref, w_ref, b_ref, o_ref, *, compute_dtype):
    # s_ref: (tile_rows, c_eff)   activation rows for this grid step
    # w_ref: (3, c_eff, c_eff)    stacked (in, out)-layout (block-diag) weights
    # b_ref: (3, 1, c_eff)        stacked (tiled) f32 bias rows
    s0 = s_ref[...].astype(jnp.float32)            # f32 copy kept for residual

    h = jnp.dot(s0.astype(compute_dtype), w_ref[0],
                preferred_element_type=jnp.float32)
    h = jnp.maximum(h + b_ref[0], 0.0)

    h = jnp.dot(h.astype(compute_dtype), w_ref[1],
                preferred_element_type=jnp.float32)
    h = jnp.maximum(h + b_ref[1], 0.0)

    h = jnp.dot(h.astype(compute_dtype), w_ref[2],
                preferred_element_type=jnp.float32)
    h = h + b_ref[2]

    o_ref[...] = (h + s0).astype(o_ref.dtype)


def prepare_params(params, *, compute_dtype=jnp.float32):
    """One-time packing of PyTorch-convention Linear params.

    params: dict with w1,b1,w2,b2,w3,b3; wX is (out, in) = (c, c), bX is (c,).
    """
    c = params["w1"].shape[0]
    pack = 128 // c if (c < 128 and 128 % c == 0) else 1
    c_eff = c * pack

    eye = jnp.eye(pack, dtype=jnp.float32)

    def pack_w(w):
        wt = jnp.asarray(w, jnp.float32).T                  # (in, out)
        return jnp.kron(eye, wt).astype(compute_dtype)      # block-diag (c_eff, c_eff)

    def pack_b(b):
        return jnp.tile(jnp.asarray(b, jnp.float32), pack).reshape(1, c_eff)

    w = jnp.stack([pack_w(params["w1"]), pack_w(params["w2"]), pack_w(params["w3"])])
    b = jnp.stack([pack_b(params["b1"]), pack_b(params["b2"]), pack_b(params["b3"])])
    return {"w": w, "b": b, "c": c, "pack": pack, "compute_dtype": compute_dtype}


def structure_module_transition_layer(s, packed, *, tile_rows=1024,
                                      vmem_budget_bytes=40 * 1024 * 1024):
    """s: [..., c] array. packed: output of prepare_params()."""
    c, pack = packed["c"], packed["pack"]
    c_eff = c * pack
    compute_dtype = packed["compute_dtype"]
    assert s.shape[-1] == c

    orig_shape = s.shape
    s2d = s.reshape(-1, c)
    n = s2d.shape[0]

    # Pad only to the packing granularity (packed rows stay sublane-aligned);
    # partial last grid blocks are masked by Pallas.
    row_align = 8 * pack
    n_pad = pl.cdiv(n, row_align) * row_align
    if n_pad != n:
        s2d = jnp.pad(s2d, ((0, n_pad - n), (0, 0)))
    n_rows = n_pad // pack                        # packed rows, multiple of 8
    s_packed = s2d.reshape(n_rows, c_eff)         # lane-dense (c_eff == 128 here)

    in_bytes = s.dtype.itemsize
    w_bytes = packed["w"].dtype.itemsize

    # Largest row tile that fits the data and a conservative VMEM budget.
    tile = max(8, (min(int(tile_rows), n_rows) // 8) * 8)

    def footprint(t):
        tiles = 2 * t * c_eff * in_bytes * 2                    # in + out, double-buffered
        weights = 2 * (3 * c_eff * c_eff * w_bytes + 3 * 8 * c_eff * 4)
        temps = 6 * t * c_eff * 4                               # f32 intermediate headroom
        return tiles + weights + temps

    while footprint(tile) > vmem_budget_bytes and tile > 8:
        tile = max(8, tile // 2)

    vmem_limit = int(min(max(footprint(tile) * 5 // 4, 16 * 1024 * 1024),
                         48 * 1024 * 1024))

    grid = (pl.cdiv(n_rows, tile),)

    kernel = functools.partial(_transition_kernel, compute_dtype=compute_dtype)

    out = pl.pallas_call(
        kernel,
        out_shape=jax.ShapeDtypeStruct((n_rows, c_eff), s.dtype),
        grid_spec=pltpu.PrefetchScalarGridSpec(
            num_scalar_prefetch=0,
            grid=grid,
            in_specs=[
                pl.BlockSpec((tile, c_eff), lambda i: (i, 0)),         # activations
                pl.BlockSpec((3, c_eff, c_eff), lambda i: (0, 0, 0)),  # stacked weights
                pl.BlockSpec((3, 1, c_eff), lambda i: (0, 0, 0)),      # stacked biases
            ],
            out_specs=pl.BlockSpec((tile, c_eff), lambda i: (i, 0)),
        ),
        compiler_params=pltpu.CompilerParams(
            dimension_semantics=("parallel",),
            vmem_limit_bytes=vmem_limit,
        ),
    )(s_packed, packed["w"], packed["b"])

    return out.reshape(n_pad, c)[:n].reshape(orig_shape)


def init_params(key, c):
    """Deterministic synthetic params (shapes match nn.Linear(c, c) x3)."""
    ks = jax.random.split(key, 6)
    scale = 0.1
    return {
        "w1": scale * jax.random.normal(ks[0], (c, c), jnp.float32),
        "b1": scale * jax.random.normal(ks[1], (c,), jnp.float32),
        "w2": scale * jax.random.normal(ks[2], (c, c), jnp.float32),
        "b2": scale * jax.random.normal(ks[3], (c,), jnp.float32),
        "w3": scale * jax.random.normal(ks[4], (c, c), jnp.float32),
        "b3": scale * jax.random.normal(ks[5], (c,), jnp.float32),
    }


def reference_forward(s, p):
    h = jnp.maximum(s @ p["w1"].T + p["b1"], 0.0)
    h = jnp.maximum(h @ p["w2"].T + p["b2"], 0.0)
    h = h @ p["w3"].T + p["b3"]
    return h + s


if __name__ == "__main__":
    key = jax.random.PRNGKey(0)
    k_s, k_p, k_s2 = jax.random.split(key, 3)

    c = 32                      # hidden channels
    params = init_params(k_p, c)
    packed_f32 = prepare_params(params, compute_dtype=jnp.float32)

    # Small shape consistent with the module.
    s = jax.random.normal(k_s, (2, 8, c), jnp.float32)
    out = jax.block_until_ready(structure_module_transition_layer(s, packed_f32))
    ref = reference_forward(s, params)
    assert out.shape == s.shape and out.dtype == s.dtype
    assert jnp.allclose(out, ref, atol=1e-5, rtol=1e-5), "f32 mismatch vs reference"

    # Exercise multi-step grid, row padding, and a partial (masked) last block.
    s_big = jax.random.normal(k_s2, (5, 25, c), jnp.float32)   # 125 rows -> pads to 128
    out_big = jax.block_until_ready(
        structure_module_transition_layer(s_big, packed_f32, tile_rows=24))
    ref_big = reference_forward(s_big, params)
    assert jnp.allclose(out_big, ref_big, atol=1e-5, rtol=1e-5), "tiled f32 mismatch"

    # bf16 matmul operands with f32 accumulation (v6e/v7x roofline option).
    packed_bf16 = prepare_params(params, compute_dtype=jnp.bfloat16)
    out_bf16 = jax.block_until_ready(
        structure_module_transition_layer(s_big, packed_bf16))
    assert jnp.allclose(out_bf16, ref_big, atol=5e-2, rtol=5e-2), "bf16 mismatch"

    print("KERNEL_OK")
</pallas_src>

<mosaic_0001>
module attributes {stable_mosaic.version = 11 : i64} {
  func.func @_transition_kernel(%arg0: i32, %arg1: memref<8x128xf32, #tpu.memory_space<vmem>>, %arg2: memref<3x128x128xf32, #tpu.memory_space<vmem>>, %arg3: memref<3x1x128xf32, #tpu.memory_space<vmem>>, %arg4: memref<8x128xf32, #tpu.memory_space<vmem>>) attributes {dimension_semantics = [#tpu.dimension_semantics<parallel>], iteration_bounds = array<i64: 1>, scalar_prefetch = 0 : i64, scratch_operands = 0 : i64, tpu.core_type = #tpu.core_type<tc>, window_params = [{transform_indices = @transform_0, window_bounds = array<i64: 8, 128>}, {pipeline_mode = #tpu.pipeline_mode<synchronous>, transform_indices = @transform_1, window_bounds = array<i64: 3, 128, 128>}, {pipeline_mode = #tpu.pipeline_mode<synchronous>, transform_indices = @transform_2, window_bounds = array<i64: 3, 1, 128>}, {transform_indices = @transform_3, window_bounds = array<i64: 8, 128>}]} {
    %c0 = arith.constant 0 : index
    %c0_0 = arith.constant 0 : index
    %0 = vector.load %arg1[%c0, %c0_0] : memref<8x128xf32, #tpu.memory_space<vmem>>, vector<8x128xf32>
    %c0_1 = arith.constant 0 : index
    %c0_2 = arith.constant 0 : index
    %c0_3 = arith.constant 0 : index
    %1 = vector.load %arg2[%c0_1, %c0_2, %c0_3] : memref<3x128x128xf32, #tpu.memory_space<vmem>>, vector<1x128x128xf32>
    %2 = vector.shape_cast %1 : vector<1x128x128xf32> to vector<128x128xf32>
    %cst = arith.constant dense<0.000000e+00> : vector<8x128xf32>
    %3 = tpu.matmul %0, %2, %cst {dimension_numbers = #tpu.dot_dimension_numbers<[1], [0], [0], [1], [0, 0, 1, 1], [], []>} : vector<8x128xf32>, vector<128x128xf32>, vector<8x128xf32> -> vector<8x128xf32>
    %c0_4 = arith.constant 0 : index
    %c0_5 = arith.constant 0 : index
    %c0_6 = arith.constant 0 : index
    %4 = vector.load %arg3[%c0_4, %c0_5, %c0_6] : memref<3x1x128xf32, #tpu.memory_space<vmem>>, vector<1x1x128xf32>
    %5 = vector.shape_cast %4 : vector<1x1x128xf32> to vector<1x128xf32>
    %6 = vector.broadcast %5 : vector<1x128xf32> to vector<8x128xf32>
    %7 = arith.addf %3, %6 : vector<8x128xf32>
    %cst_7 = arith.constant 0.000000e+00 : f32
    %8 = vector.broadcast %cst_7 : f32 to vector<8x128xf32>
    %9 = arith.maximumf %7, %8 : vector<8x128xf32>
    %c1 = arith.constant 1 : index
    %c0_8 = arith.constant 0 : index
    %c0_9 = arith.constant 0 : index
    %10 = vector.load %arg2[%c1, %c0_8, %c0_9] : memref<3x128x128xf32, #tpu.memory_space<vmem>>, vector<1x128x128xf32>
    %11 = vector.shape_cast %10 : vector<1x128x128xf32> to vector<128x128xf32>
    %cst_10 = arith.constant dense<0.000000e+00> : vector<8x128xf32>
    %12 = tpu.matmul %9, %11, %cst_10 {dimension_numbers = #tpu.dot_dimension_numbers<[1], [0], [0], [1], [0, 0, 1, 1], [], []>} : vector<8x128xf32>, vector<128x128xf32>, vector<8x128xf32> -> vector<8x128xf32>
    %c1_11 = arith.constant 1 : index
    %c0_12 = arith.constant 0 : index
    %c0_13 = arith.constant 0 : index
    %13 = vector.load %arg3[%c1_11, %c0_12, %c0_13] : memref<3x1x128xf32, #tpu.memory_space<vmem>>, vector<1x1x128xf32>
    %14 = vector.shape_cast %13 : vector<1x1x128xf32> to vector<1x128xf32>
    %15 = vector.broadcast %14 : vector<1x128xf32> to vector<8x128xf32>
    %16 = arith.addf %12, %15 : vector<8x128xf32>
    %cst_14 = arith.constant 0.000000e+00 : f32
    %17 = vector.broadcast %cst_14 : f32 to vector<8x128xf32>
    %18 = arith.maximumf %16, %17 : vector<8x128xf32>
    %c2 = arith.constant 2 : index
    %c0_15 = arith.constant 0 : index
    %c0_16 = arith.constant 0 : index
    %19 = vector.load %arg2[%c2, %c0_15, %c0_16] : memref<3x128x128xf32, #tpu.memory_space<vmem>>, vector<1x128x128xf32>
    %20 = vector.shape_cast %19 : vector<1x128x128xf32> to vector<128x128xf32>
    %cst_17 = arith.constant dense<0.000000e+00> : vector<8x128xf32>
    %21 = tpu.matmul %18, %20, %cst_17 {dimension_numbers = #tpu.dot_dimension_numbers<[1], [0], [0], [1], [0, 0, 1, 1], [], []>} : vector<8x128xf32>, vector<128x128xf32>, vector<8x128xf32> -> vector<8x128xf32>
    %c2_18 = arith.constant 2 : index
    %c0_19 = arith.constant 0 : index
    %c0_20 = arith.constant 0 : index
    %22 = vector.load %arg3[%c2_18, %c0_19, %c0_20] : memref<3x1x128xf32, #tpu.memory_space<vmem>>, vector<1x1x128xf32>
    %23 = vector.shape_cast %22 : vector<1x1x128xf32> to vector<1x128xf32>
    %24 = vector.broadcast %23 : vector<1x128xf32> to vector<8x128xf32>
    %25 = arith.addf %21, %24 : vector<8x128xf32>
    %26 = arith.addf %25, %0 : vector<8x128xf32>
    %c0_21 = arith.constant 0 : index
    %c0_22 = arith.constant 0 : index
    %27 = vector.load %arg4[%c0_21, %c0_22] : memref<8x128xf32, #tpu.memory_space<vmem>>, vector<8x128xf32>
    tpu.vector_store %arg4[%c0_21, %c0_22], %26 {strides = array<i32>} : memref<8x128xf32, #tpu.memory_space<vmem>>, vector<8x128xf32>,
    return
  }
  func.func @transform_0(%arg0: i32) -> (i32, i32) {
    %c0_i32 = arith.constant 0 : i32
    %c0_i32_0 = arith.constant 0 : i32
    return %arg0, %c0_i32 : i32, i32
  }
  func.func @transform_1(%arg0: i32) -> (i32, i32, i32) {
    %c0_i32 = arith.constant 0 : i32
    %c0_i32_0 = arith.constant 0 : i32
    %c0_i32_1 = arith.constant 0 : i32
    %c0_i32_2 = arith.constant 0 : i32
    return %c0_i32, %c0_i32_0, %c0_i32_1 : i32, i32, i32
  }
  func.func @transform_2(%arg0: i32) -> (i32, i32, i32) {
    %c0_i32 = arith.constant 0 : i32
    %c0_i32_0 = arith.constant 0 : i32
    %c0_i32_1 = arith.constant 0 : i32
    %c0_i32_2 = arith.constant 0 : i32
    return %c0_i32, %c0_i32_0, %c0_i32_1 : i32, i32, i32
  }
  func.func @transform_3(%arg0: i32) -> (i32, i32) {
    %c0_i32 = arith.constant 0 : i32
    %c0_i32_0 = arith.constant 0 : i32
    return %arg0, %c0_i32 : i32, i32
  }
}

</mosaic_0001>

<bundles_post_ra>
// kernel: tpu_custom_call.1
= control target key start
LH: loop header
LB: loop body
LE: loop exit
PB: predicated region body
PF: predicated region fallthrough
CT: control target
= control target key end

     0   :  { %8 = vsyncpa [#allocation3], 0  ;;  %s360_s0 = inlined_call_operand.hbm [shape: f32[8,128], index: 0, kind: input, shape index: {}]   ;;  %s361_s1 = inlined_call_operand.hbm [shape: f32[3,128,128], index: 1, kind: input, shape index: {}]   ;;  %s362_s2 = inlined_call_operand.hbm [shape: f32[3,1,128], index: 2, kind: input, shape index: {}]   ;;  %s363_s3 = inlined_call_operand.hbm [shape: f32[8,128], index: 3, kind: output, shape index: {}]  }
   0x1   :  { %9 = vsyncpa [#allocation6], 0  ;;  %s26_s14 = sshll.u32 %s361_s1, 4  ;;  %s27_s14 = int_to_ptr.hbm [resolvable:$true] %s26_s14 }
   0x2   :  { %10 = vsyncpa [#allocation4], 0  ;;  %s320_s15 = smov [#allocation5]   ;;  %s16_s19 = sshll.u32 %s360_s0, 4  ;;  %s17_s19 = int_to_ptr.hbm [resolvable:$true] %s16_s19 }
   0x3   :  { %s28_s16 = sshll.u32 %s320_s15, 4  ;;  %s321_s20 = smov 128   ;;  %s29_s16 = int_to_ptr.vmem [resolvable:$true] %s28_s16 }
   0x4   :  { %s322_s21 = smov 8   ;;  %s323_s22 = smov [#allocation2]  }
   0x5   :  { %34 = dma.hbm_to_vmem [thread:$0]  %s27_s14, 6144, %s29_s16, [#allocation6], %s321_s20, %s321_s20, %s322_s21  }
   0x6   :  { %s18_s23 = sshll.u32 %s323_s22, 4  ;;  %s39_s26 = sshll.u32 %s362_s2, 4  ;;  %s19_s23 = int_to_ptr.vmem [resolvable:$true] %s18_s23  ;;  %s40_s26 = int_to_ptr.hbm [resolvable:$true] %s39_s26 }
   0x7   :  { %21 = dma.hbm_to_vmem [thread:$0]  %s17_s19, 128, %s19_s23, [#allocation3]  }
   0x8   :  { %s324_s1 = smov [#allocation7]   ;;  %s325_s28 = smov 16  }
   0x9   :  { %s41_s27 = sshll.u32 %s324_s1, 4  ;;  %s326_s29 = smov 1   ;;  %s42_s27 = int_to_ptr.vmem [resolvable:$true] %s41_s27 }
   0xa   :  { %47 = dma.hbm_to_vmem [thread:$0]  %s40_s26, 48, %s42_s27, [#allocation6], %s325_s28, %s325_s28, %s326_s29  }
   0xb   :  { %314 = dma.done.wait [#allocation3], 128  }
   0xc   :  { %315 = vsyncadd [#allocation3], 4294967168 }
   0xd   :  { %316 = dma.done.wait [#allocation6], 6192  }
   0xe   :  { %317 = vsyncadd [#allocation6], 4294961104  ;;  %v76_v0 = vld [vmem:[#allocation5 + $0x78] sm:$0xff]  ;;  %v75_v1 = vld [vmem:[#allocation5 + $0x70] sm:$0xff]  ;;  %s327_s0 = smov [#allocation8]   ;;  %s196_s5 = sshll.u32 %s363_s3, 4  ;;  %s197_s5 = int_to_ptr.hbm [resolvable:$true] %s196_s5 }
   0xf   :  { %81 = vmatpush.msra.mxu0 %v76_v0  ;;  %v74_v2 = vld [vmem:[#allocation5 + $0x68] sm:$0xff]  ;;  %v73_v3 = vld [vmem:[#allocation5 + $0x60] sm:$0xff]  ;;  %v118_v4 = vld [vmem:[#allocation5 + $0xf8] sm:$0xff]  ;;  %s194_s2 = sshll.u32 %s327_s0, 4  ;;  %s195_s2 = int_to_ptr.vmem [resolvable:$true] %s194_s2 }
  0x10   :  { %v72_v5 = vld [vmem:[#allocation5 + $0x58] sm:$0xff]  ;;  %124 = vmatpush.msra.mxu1 %v118_v4  ;;  %v117_v6 = vld [vmem:[#allocation5 + $0xf0] sm:$0xff]  ;;  %v116_v7 = vld [vmem:[#allocation5 + $0xe8] sm:$0xff] }
  0x11   :  { %82 = vmatpush.msra.mxu0 %v75_v1  ;;  %v71_v8 = vld [vmem:[#allocation5 + $0x50] sm:$0xff]  ;;  %v115_v9 = vld [vmem:[#allocation5 + $0xe0] sm:$0xff]  ;;  %v70_v10 = vld [vmem:[#allocation5 + $0x48] sm:$0xff] }
  0x12   :  { %125 = vmatpush.msra.mxu1 %v117_v6  ;;  %v114_v11 = vld [vmem:[#allocation5 + $0xd8] sm:$0xff]  ;;  %v69_v12 = vld [vmem:[#allocation5 + $0x40] sm:$0xff]  ;;  %v113_v13 = vld [vmem:[#allocation5 + $0xd0] sm:$0xff] }
  0x13   :  { %83 = vmatpush.msra.mxu0 %v74_v2  ;;  %v68_v14 = vld [vmem:[#allocation5 + $0x38] sm:$0xff]  ;;  %v112_v15 = vld [vmem:[#allocation5 + $0xc8] sm:$0xff]  ;;  %v67_v16 = vld [vmem:[#allocation5 + $0x30] sm:$0xff] }
  0x14   :  { %126 = vmatpush.msra.mxu1 %v116_v7  ;;  %v111_v17 = vld [vmem:[#allocation5 + $0xc0] sm:$0xff]  ;;  %v66_v18 = vld [vmem:[#allocation5 + $0x28] sm:$0xff]  ;;  %v110_v19 = vld [vmem:[#allocation5 + $0xb8] sm:$0xff] }
  0x15   :  { %84 = vmatpush.msra.mxu0 %v73_v3  ;;  %v65_v20 = vld [vmem:[#allocation5 + $0x20] sm:$0xff]  ;;  %v109_v21 = vld [vmem:[#allocation5 + $0xb0] sm:$0xff]  ;;  %v64_v22 = vld [vmem:[#allocation5 + $0x18] sm:$0xff] }
  0x16   :  { %127 = vmatpush.msra.mxu1 %v115_v9  ;;  %v108_v23 = vld [vmem:[#allocation5 + $0xa8] sm:$0xff]  ;;  %v63_v24 = vld [vmem:[#allocation5 + $0x10] sm:$0xff]  ;;  %v107_v25 = vld [vmem:[#allocation5 + $0xa0] sm:$0xff] }
  0x17   :  { %85 = vmatpush.msra.mxu0 %v72_v5  ;;  %v62_v26 = vld [vmem:[#allocation5 + $0x8] sm:$0xff]  ;;  %v106_v27 = vld [vmem:[#allocation5 + $0x98] sm:$0xff]  ;;  %v61_v28 = vld [vmem:[#allocation5] sm:$0xff] }
  0x18   :  { %128 = vmatpush.msra.mxu1 %v114_v11  ;;  %v60_v29 = vld [vmem:[#allocation2] sm:$0xff]  ;;  %v105_v30 = vld [vmem:[#allocation5 + $0x90] sm:$0xff]  ;;  %v104_v31 = vld [vmem:[#allocation5 + $0x88] sm:$0xff] }
  0x19   :  { %86 = vmatpush.msra.mxu0 %v71_v8  ;;  %v103_v32 = vld [vmem:[#allocation5 + $0x80] sm:$0xff]  ;;  %v161_v33 = vld [vmem:[#allocation5 + $0x178] sm:$0xff]  ;;  %v160_v34 = vld [vmem:[#allocation5 + $0x170] sm:$0xff] }
  0x1a   :  { %129 = vmatpush.msra.mxu1 %v113_v13  ;;  %167 = vmatpush.msra.mxu2 %v161_v33  ;;  %v159_v35 = vld [vmem:[#allocation5 + $0x168] sm:$0xff]  ;;  %v158_v36 = vld [vmem:[#allocation5 + $0x160] sm:$0xff]  ;;  %v157_v37 = vld [vmem:[#allocation5 + $0x158] sm:$0xff] }
  0x1b   :  { %87 = vmatpush.msra.mxu0 %v70_v10  ;;  %v156_v38 = vld [vmem:[#allocation5 + $0x150] sm:$0xff]  ;;  %v155_v39 = vld [vmem:[#allocation5 + $0x148] sm:$0xff]  ;;  %v154_v40 = vld [vmem:[#allocation5 + $0x140] sm:$0xff] }
  0x1c   :  { %130 = vmatpush.msra.mxu1 %v112_v15  ;;  %168 = vmatpush.msra.mxu2 %v160_v34  ;;  %v153_v41 = vld [vmem:[#allocation5 + $0x138] sm:$0xff]  ;;  %v152_v42 = vld [vmem:[#allocation5 + $0x130] sm:$0xff]  ;;  %v151_v43 = vld [vmem:[#allocation5 + $0x128] sm:$0xff] }
  0x1d   :  { %88 = vmatpush.msra.mxu0 %v69_v12  ;;  %v150_v44 = vld [vmem:[#allocation5 + $0x120] sm:$0xff]  ;;  %v149_v45 = vld [vmem:[#allocation5 + $0x118] sm:$0xff]  ;;  %v148_v50 = vld [vmem:[#allocation5 + $0x110] sm:$0xff] }
  0x1e   :  { %131 = vmatpush.msra.mxu1 %v111_v17  ;;  %169 = vmatpush.msra.mxu2 %v159_v35  ;;  %v215_v46 = vld [vmem:[#allocation7] ss:$0 sm:$0xff]  ;;  %v147_v51 = vld [vmem:[#allocation5 + $0x108] sm:$0xff]  ;;  %v216_v53 = vld [vmem:[#allocation7 + $0x1] ss:$0 sm:$0xff] }
  0x1f   :  { %89 = vmatpush.msra.mxu0 %v68_v14  ;;  %v146_v52 = vld [vmem:[#allocation5 + $0x100] sm:$0xff] }
  0x20   :  { %132 = vmatpush.msra.mxu1 %v110_v19  ;;  %170 = vmatpush.msra.mxu2 %v158_v36  ;;  %v217_v57 = vld [vmem:[#allocation7 + $0x2] ss:$0 sm:$0xff] }
  0x21   :  { %90 = vmatpush.msra.mxu0 %v67_v16 }
  0x22   :  { %133 = vmatpush.msra.mxu1 %v109_v21  ;;  %171 = vmatpush.msra.mxu2 %v157_v37 }
  0x23   :  { %91 = vmatpush.msra.mxu0 %v66_v18 }
  0x24   :  { %134 = vmatpush.msra.mxu1 %v108_v23  ;;  %172 = vmatpush.msra.mxu2 %v156_v38 }
  0x25   :  { %92 = vmatpush.msra.mxu0 %v65_v20 }
  0x26   :  { %135 = vmatpush.msra.mxu1 %v107_v25  ;;  %173 = vmatpush.msra.mxu2 %v155_v39 }
  0x27   :  { %93 = vmatpush.msra.mxu0 %v64_v22 }
  0x28   :  { %136 = vmatpush.msra.mxu1 %v106_v27  ;;  %174 = vmatpush.msra.mxu2 %v154_v40 }
  0x29   :  { %94 = vmatpush.msra.mxu0 %v63_v24 }
  0x2a   :  { %137 = vmatpush.msra.mxu1 %v105_v30  ;;  %175 = vmatpush.msra.mxu2 %v153_v41 }
  0x2b   :  { %95 = vmatpush.msra.mxu0 %v62_v26 }
  0x2c   :  { %138 = vmatpush.msra.mxu1 %v104_v31  ;;  %176 = vmatpush.msra.mxu2 %v152_v42 }
  0x2d   :  { %96 = vmatpush.msra.mxu0 %v61_v28 }
  0x2e   :  { %97 = vmatmul.f32.vlgmr.msra.gmra.mxu0 %v60_v29  ;;  %139 = vmatpush.msra.mxu1 %v103_v32 }
  0x2f   :  { %177 = vmatpush.msra.mxu2 %v151_v43 }
  0x31   :  { %178 = vmatpush.msra.mxu2 %v150_v44 }
  0x33   :  { %179 = vmatpush.msra.mxu2 %v149_v45 }
  0x35   :  { %180 = vmatpush.msra.mxu2 %v148_v50 }
  0x37   :  { %181 = vmatpush.msra.mxu2 %v147_v51 }
  0x39   :  { %182 = vmatpush.msra.mxu2 %v146_v52 }
  0xab   :  { %v98_v47 = vpop.f32.mrf.mxu0 }
  0xac   :  { %v99_v48 = vadd.f32 %v215_v46, %v98_v47 }
  0xae   :  { %v101_v49 = vmax.f32 %v99_v48, 0.0 }
  0xb0   :  { %140 = vmatmul.f32.vlgmr.msra.gmra.mxu1 %v101_v49 }
 0x12d   :  { %v141_v54 = vpop.f32.mrf.mxu1 }
 0x12e   :  { %v142_v55 = vadd.f32 %v216_v53, %v141_v54 }
 0x130   :  { %v144_v56 = vmax.f32 %v142_v55, 0.0 }
 0x132   :  { %183 = vmatmul.f32.vlgmr.msra.gmra.mxu2 %v144_v56 }
 0x1b5   :  { %v184_v58 = vpop.f32.mrf.mxu2 }
 0x1b6   :  { %v185_v59 = vadd.f32 %v217_v57, %v184_v58 }
 0x1b8   :  { %v187_v60 = vadd.f32 %v185_v59, %v60_v29 }
 0x1ba   :  { %188 = vst [vmem:[#allocation8] sm:$0xff] %v187_v60 }
 0x1bb   :  { %199 = dma.vmem_to_hbm [thread:$0]  %s195_s2, 128, %s197_s5, [#allocation4]  }
 0x1bc   :  { %318 = dma.done.wait [#allocation4], 128  }
 0x1bd   :  { %319 = vsyncadd [#allocation4], 4294967168 }
 0x1be   :  { %204 = vsyncpa [#allocation3], 1 }
 0x1bf   :  { %205 = vsyncpa [#allocation6], 1 }
 0x1c0   :  { %206 = vsyncpa [#allocation4], 1 }

</bundles_post_ra>
